<compile_context>
chip_gen: v6e
topology: v6e:2x2x1
jax: 0.10.0
libtpu: 0.0.40
codegen_flags: <defaults>
</compile_context>

<pallas_src>
import functools

import jax
import jax.numpy as jnp
from jax.experimental import pallas as pl
from jax.experimental.pallas import tpu as pltpu

HIDDEN = 30
_SLAB_COLS = HIDDEN + 5   # [ W2 (30x30, out-in) | w1 | b1 | b2 | w3 | b3(row 0) ]


def _mlp_kernel(slab_ref, t_ref, out_ref, *, bf16_tanh=False):
    """One batch tile: t (1, TN) -> out (1, TN), feature-major compute."""
    h = HIDDEN
    t = t_ref[...]                                # (1, TN)   lanes = batch
    w2 = slab_ref[:, 0:h]                         # (30, 30)  (out, in)
    w1 = slab_ref[:, h:h + 1]                     # (30, 1)   layer-1 weight column
    b1 = slab_ref[:, h + 1:h + 2]                 # (30, 1)
    b2 = slab_ref[:, h + 2:h + 3]                 # (30, 1)
    w3 = slab_ref[:, h + 3:h + 4]                 # (30, 1)   layer-3 weight column
    b3 = slab_ref[0:1, h + 4:h + 5]               # (1, 1)

    def act(x):
        # Optional bf16 tanh (v6e/v7x EUP bf16 path).  Default f32 (exact, v5e-safe).
        if bf16_tanh:
            return jnp.tanh(x.astype(jnp.bfloat16)).astype(jnp.float32)
        return jnp.tanh(x)

    # Layer 1: in_features == 1 -> broadcasted multiply (VPU) + tanh (EUP).
    h1 = act(w1 * t + b1)                         # (30, TN)
    # Layer 2: (30,30) @ (30,TN) on the MXU; lane-dense result.
    h2 = act(jnp.dot(w2, h1, preferred_element_type=jnp.float32) + b2)   # (30, TN)
    # Layer 3: 30 -> 1 as VPU multiply + sublane reduce (skip the MXU).
    out_ref[...] = jnp.sum(h2 * w3, axis=0, keepdims=True) + b3   # (1, TN)


def _round_up(x, m):
    return (x + m - 1) // m * m


def _choose_tile(n, tn):
    """Lane tile: multiple of 128, <= tn, and >= 2 grid steps when n > 128
    (so v7x's two TensorCores both get work)."""
    tn = max(128, _round_up(int(tn), 128))
    blocks = _round_up(n, 128) // 128
    if blocks <= 1:
        return 128
    half_blocks = (blocks + 1) // 2
    return min(tn, half_blocks * 128)


def pack_params(params):
    """Pack the six Linear params (stored in x out) into one (30, 35) f32 slab."""
    w1, b1, w2, b2, w3, b3 = params
    b3_col = jnp.zeros((HIDDEN, 1), jnp.float32).at[0, 0].set(b3[0, 0])
    return jnp.concatenate(
        [
            w2.T,                       # (30, 30)  feature-major (out, in)
            w1.reshape(1, HIDDEN).T,    # (30, 1)
            b1.reshape(1, HIDDEN).T,    # (30, 1)
            b2.reshape(1, HIDDEN).T,    # (30, 1)
            w3.reshape(HIDDEN, 1),      # (30, 1)
            b3_col,                     # (30, 1), b3 in row 0
        ],
        axis=1,
    ).astype(jnp.float32)               # (30, 35)


def _prep_t(t, tn):
    t_flat = jnp.asarray(t, jnp.float32).reshape(-1)
    n = t_flat.shape[0]
    tile = _choose_tile(n, tn)
    n_pad = _round_up(n, tile)
    t_fm = jnp.pad(t_flat, (0, n_pad - n)).reshape(1, n_pad)   # (1, N_pad), lanes=batch
    return t_fm, n, tile, n_pad


@functools.partial(jax.jit, static_argnames=("tn", "bf16_tanh"))
def pinn_bayes_forward(t, slab, *, tn=4096, bf16_tanh=False):
    """Forward pass of PINN_Bayes.hidden_layer. t: (N, 1) or (N,) -> (N, 1).
    `slab` is pack_params(params), shape (30, 35)."""
    t_fm, n, tile, n_pad = _prep_t(t, tn)

    out_fm = pl.pallas_call(
        functools.partial(_mlp_kernel, bf16_tanh=bf16_tanh),
        out_shape=jax.ShapeDtypeStruct((1, n_pad), jnp.float32),
        grid=(n_pad // tile,),
        in_specs=[
            # Single packed weight slab: one DMA, resident across all batch tiles.
            pl.BlockSpec((HIDDEN, _SLAB_COLS), lambda i: (0, 0)),
            # Streamed batch tile of time points (lanes = batch).
            pl.BlockSpec((1, tile), lambda i: (0, i)),
        ],
        out_specs=pl.BlockSpec((1, tile), lambda i: (0, i)),
        compiler_params=pltpu.CompilerParams(
            dimension_semantics=("parallel",),
            vmem_limit_bytes=64 * 1024 * 1024,
        ),
    )(slab, t_fm)

    return out_fm[0, :n].reshape(n, 1)


@functools.partial(jax.jit, static_argnames=("tn", "bf16_tanh"))
def pinn_bayes_forward_samples(t, slabs, *, tn=4096, bf16_tanh=False):
    """Batched forward over S Bayesian weight samples in ONE kernel launch.
    t: (N, 1) or (N,); slabs: (S, 30, 35) -> (S, N, 1)."""
    t_fm, n, tile, n_pad = _prep_t(t, tn)
    s = slabs.shape[0]

    out_fm = pl.pallas_call(
        functools.partial(_mlp_kernel, bf16_tanh=bf16_tanh),
        out_shape=jax.ShapeDtypeStruct((s, 1, n_pad), jnp.float32),
        grid=(s, n_pad // tile),
        in_specs=[
            # One slab per sample (leading dim squeezed away inside the kernel).
            pl.BlockSpec((None, HIDDEN, _SLAB_COLS), lambda si, i: (si, 0, 0)),
            # Same time points for every sample.
            pl.BlockSpec((1, tile), lambda si, i: (0, i)),
        ],
        out_specs=pl.BlockSpec((None, 1, tile), lambda si, i: (si, 0, i)),
        compiler_params=pltpu.CompilerParams(
            dimension_semantics=("parallel", "parallel"),
            vmem_limit_bytes=64 * 1024 * 1024,
        ),
    )(slabs, t_fm)

    return out_fm[:, 0, :n].reshape(s, n, 1)


def init_params(key):
    """Deterministic init matching the nn.Linear shapes (PyTorch-style uniform),
    stored as (in_features, out_features) so reference is y = x @ W + b."""
    k1, k2, k3, k4, k5, k6 = jax.random.split(key, 6)

    def uni(k, shape, fan_in):
        bound = 1.0 / jnp.sqrt(float(fan_in))
        return jax.random.uniform(k, shape, jnp.float32, -bound, bound)

    w1 = uni(k1, (1, HIDDEN), 1)             # Linear(1, 30)
    b1 = uni(k2, (1, HIDDEN), 1)
    w2 = uni(k3, (HIDDEN, HIDDEN), HIDDEN)   # Linear(30, 30)
    b2 = uni(k4, (1, HIDDEN), HIDDEN)
    w3 = uni(k5, (HIDDEN, 1), HIDDEN)        # Linear(30, 1)
    b3 = uni(k6, (1, 1), HIDDEN)
    return (w1, b1, w2, b2, w3, b3)


def reference_forward(t, params):
    w1, b1, w2, b2, w3, b3 = params
    h1 = jnp.tanh(t @ w1 + b1)
    h2 = jnp.tanh(h1 @ w2 + b2)
    return h2 @ w3 + b3


if __name__ == "__main__":
    key = jax.random.PRNGKey(0)
    pkey, tkey, skey = jax.random.split(key, 3)
    params = init_params(pkey)
    slab = pack_params(params)

    # Small batch of collocation time points, shape (N, 1); N deliberately not a
    # multiple of 128 to exercise the lane-padding path and the >=2-step tiling.
    n = 200
    t = jax.random.uniform(tkey, (n, 1), jnp.float32, 0.0, 1.0)

    # --- single-parameter-sample forward ---
    out = jax.block_until_ready(pinn_bayes_forward(t, slab))
    ref = reference_forward(t, params)
    assert out.shape == (n, 1)
    assert jnp.allclose(out, ref, atol=1e-5, rtol=1e-5), float(
        jnp.max(jnp.abs(out - ref))
    )

    # --- S Bayesian weight samples in one launch (samples simulated as mu + noise) ---
    S = 4
    sampled_params = []
    keys = jax.random.split(skey, S)
    for i in range(S):
        ks = jax.random.split(keys[i], 6)
        sampled_params.append(tuple(
            p + 0.01 * jax.random.normal(ks[j], p.shape, jnp.float32)
            for j, p in enumerate(params)
        ))
    slabs = jnp.stack([pack_params(p) for p in sampled_params], axis=0)   # (S, 30, 35)

    out_s = jax.block_until_ready(pinn_bayes_forward_samples(t, slabs))
    assert out_s.shape == (S, n, 1)
    for i in range(S):
        ref_i = reference_forward(t, sampled_params[i])
        assert jnp.allclose(out_s[i], ref_i, atol=1e-5, rtol=1e-5), float(
            jnp.max(jnp.abs(out_s[i] - ref_i))
        )

    print("KERNEL_OK")
</pallas_src>

<mosaic_0001>
module attributes {stable_mosaic.version = 11 : i64} {
  func.func @_mlp_kernel(%arg0: i32, %arg1: memref<30x35xf32, #tpu.memory_space<vmem>>, %arg2: memref<1x128xf32, #tpu.memory_space<vmem>>, %arg3: memref<1x128xf32, #tpu.memory_space<vmem>>) attributes {dimension_semantics = [#tpu.dimension_semantics<parallel>], iteration_bounds = array<i64: 2>, scalar_prefetch = 0 : i64, scratch_operands = 0 : i64, tpu.core_type = #tpu.core_type<tc>, window_params = [{pipeline_mode = #tpu.pipeline_mode<synchronous>, transform_indices = @transform_0, window_bounds = array<i64: 30, 35>}, {transform_indices = @transform_1, window_bounds = array<i64: 1, 128>}, {transform_indices = @transform_2, window_bounds = array<i64: 1, 128>}]} {
    %c0 = arith.constant 0 : index
    %c0_0 = arith.constant 0 : index
    %0 = vector.load %arg2[%c0, %c0_0] : memref<1x128xf32, #tpu.memory_space<vmem>>, vector<1x128xf32>
    %c0_1 = arith.constant 0 : index
    %c0_2 = arith.constant 0 : index
    %1 = vector.load %arg1[%c0_1, %c0_2] : memref<30x35xf32, #tpu.memory_space<vmem>>, vector<30x30xf32>
    %c0_3 = arith.constant 0 : index
    %c30 = arith.constant 30 : index
    %2 = vector.load %arg1[%c0_3, %c30] : memref<30x35xf32, #tpu.memory_space<vmem>>, vector<30x1xf32>
    %c0_4 = arith.constant 0 : index
    %c31 = arith.constant 31 : index
    %3 = vector.load %arg1[%c0_4, %c31] : memref<30x35xf32, #tpu.memory_space<vmem>>, vector<30x1xf32>
    %c0_5 = arith.constant 0 : index
    %c32 = arith.constant 32 : index
    %4 = vector.load %arg1[%c0_5, %c32] : memref<30x35xf32, #tpu.memory_space<vmem>>, vector<30x1xf32>
    %c0_6 = arith.constant 0 : index
    %c33 = arith.constant 33 : index
    %5 = vector.load %arg1[%c0_6, %c33] : memref<30x35xf32, #tpu.memory_space<vmem>>, vector<30x1xf32>
    %c0_7 = arith.constant 0 : index
    %c34 = arith.constant 34 : index
    %6 = vector.load %arg1[%c0_7, %c34] : memref<30x35xf32, #tpu.memory_space<vmem>>, vector<1x1xf32>
    %7 = vector.broadcast %2 : vector<30x1xf32> to vector<30x128xf32>
    %8 = vector.broadcast %0 : vector<1x128xf32> to vector<30x128xf32>
    %9 = arith.mulf %7, %8 : vector<30x128xf32>
    %10 = vector.broadcast %3 : vector<30x1xf32> to vector<30x128xf32>
    %11 = arith.addf %9, %10 : vector<30x128xf32>
    %12 = math.tanh %11 : vector<30x128xf32>
    %cst = arith.constant dense<0.000000e+00> : vector<30x128xf32>
    %13 = tpu.matmul %1, %12, %cst {dimension_numbers = #tpu.dot_dimension_numbers<[1], [0], [0], [1], [0, 0, 1, 1], [], []>} : vector<30x30xf32>, vector<30x128xf32>, vector<30x128xf32> -> vector<30x128xf32>
    %14 = vector.broadcast %4 : vector<30x1xf32> to vector<30x128xf32>
    %15 = arith.addf %13, %14 : vector<30x128xf32>
    %16 = math.tanh %15 : vector<30x128xf32>
    %17 = vector.broadcast %5 : vector<30x1xf32> to vector<30x128xf32>
    %18 = arith.mulf %16, %17 : vector<30x128xf32>
    %cst_8 = arith.constant dense<0.000000e+00> : vector<128xf32>
    %19 = vector.multi_reduction <add>, %18, %cst_8 [0] : vector<30x128xf32> to vector<128xf32>
    %20 = vector.shape_cast %19 : vector<128xf32> to vector<1x128xf32>
    %21 = vector.broadcast %6 : vector<1x1xf32> to vector<1x128xf32>
    %22 = arith.addf %20, %21 : vector<1x128xf32>
    %c0_9 = arith.constant 0 : index
    %c0_10 = arith.constant 0 : index
    %23 = vector.load %arg3[%c0_9, %c0_10] : memref<1x128xf32, #tpu.memory_space<vmem>>, vector<1x128xf32>
    tpu.vector_store %arg3[%c0_9, %c0_10], %22 {strides = array<i32>} : memref<1x128xf32, #tpu.memory_space<vmem>>, vector<1x128xf32>,
    return
  }
  func.func @transform_0(%arg0: i32) -> (i32, i32) {
    %c0_i32 = arith.constant 0 : i32
    %c0_i32_0 = arith.constant 0 : i32
    %c0_i32_1 = arith.constant 0 : i32
    return %c0_i32, %c0_i32_0 : i32, i32
  }
  func.func @transform_1(%arg0: i32) -> (i32, i32) {
    %c0_i32 = arith.constant 0 : i32
    %c0_i32_0 = arith.constant 0 : i32
    return %c0_i32, %arg0 : i32, i32
  }
  func.func @transform_2(%arg0: i32) -> (i32, i32) {
    %c0_i32 = arith.constant 0 : i32
    %c0_i32_0 = arith.constant 0 : i32
    return %c0_i32, %arg0 : i32, i32
  }
}

</mosaic_0001>

<bundles_post_ra>
// kernel: pinn_bayes_forward.1
= control target key start
LH: loop header
LB: loop body
LE: loop exit
PB: predicated region body
PF: predicated region fallthrough
CT: control target
= control target key end

     0   :  { %7 = vsyncpa [#allocation3], 0  ;;  %s579_s9 = smov 0   ;;  %s645_s0 = inlined_call_operand.hbm [shape: f32[30,35], index: 0, kind: input, shape index: {}]   ;;  %s646_s1 = inlined_call_operand.vmem [shape: f32[1,256], index: 1, kind: input, shape index: {}]   ;;  %s647_s2 = inlined_call_operand.vmem [shape: f32[1,256], index: 2, kind: output, shape index: {}]  }
   0x1 LB: > { %s585_s10 = sadd.s32 4294967295, %s554_s9   ;;  %p422_p0 = scmp.ge.s32.totalorder %s554_s9, 1  ;;  %s554_s9 = sphi %s579_s9, %s13_s9  }
   0x2   : > { %p91_p1 = scmp.lt.s32.totalorder %s554_s9, 3  ;;  %s556_s11 = smov [#allocation2]  }
   0x3   : > { %s103_s12 = sshll.u32 %s556_s11, 4  ;;  %p473_p3 = scmp.eq.s32.totalorder %s585_s10, 0  ;;  %s104_s12 = int_to_ptr.vmem [resolvable:$true] %s103_s12 }
   0x4   : > { %p589_p2 = pnand %p422_p0, %p91_p1  ;;  %s529_s14 = scalar_lea.vmem %s104_s12, 512 }
   0x5   : > { %p530_p7 = scmp.ne.s32.totalorder %s104_s12, %s529_s14  ;;  %p537_p10 = scmp.lt.s32.totalorder %s104_s12, %s104_s12 }
   0x6   : > { %p469_p4 = pneg %p589_p2  ;;  %p538_p11 = scmp.lt.s32.totalorder %s529_s14, %s529_s14 }
   0x8   : > { %p470_p5 = pnand %p473_p3, %p469_p4  ;;  %p539_p12 = por %p538_p11, %p537_p10 }
   0xa   : > { %p520_p6 = pneg %p470_p5 }
   0xc   : > { %p532_p8 = pnand %p530_p7, %p520_p6 }
   0xe   : > { %p533_p9 = pneg %p532_p8 }
  0x10   : > { %p540_p13 = pnand %p539_p12, %p533_p9 }
  0x12   : > { %543 = shalt.err (!%p540_p13)
}
  0x13   : > { %s557_s15 = smov 128   ;;  %s558_s16 = smov 8  }
  0x14   : > { %472 = dma.hbm_to_vmem [thread:$0]  (!%p470_p5), %s645_s0, 512, %s104_s12, [#allocation3], %s557_s15, %s557_s15, %s558_s16  }
  0x15   : > { %125 = sbr.rel (%p589_p2) target bundleno = 421 (0x1a5), region = 28 }
  0x1a   : > { %549 = dma.done.wait (%p473_p3), [#allocation3], 512  }
  0x1b   : > { %551 = vsyncadd (%p473_p3), [#allocation3], 4294966784  ;;  %v559_v0 = vmov 31   ;;  %v560_v1 = vmov 30   ;;  %v607_v2 = vld [vmem:[#allocation2 + $0x18] sm:$0x3f] }
  0x1c   : > { %492 = vset.pattern.permute.xlu1 %v559_v0  ;;  %491 = vset.pattern.permute.xlu0 %v560_v1  ;;  %v152_v3 = vld [vmem:[#allocation2 + $0x10] sm:$0xff]  ;;  %v611_v4 = vld [vmem:[#allocation2 + $0x8] sm:$0xff]  ;;  %v150_v5 = vld [vmem:[#allocation2] sm:$0xff]  ;;  %vm225_vm0 = vcmask 244736   ;;  %v561_v6 = vmov 32   ;;  %v562_v7 = vmov 33  }
  0x1d   : > { %198 = vperm.xlu1 %492, %v607_v2   ;;  %172 = vperm.xlu0 %491, %v607_v2   ;;  %v563_v8 = vmov 34   ;;  %v154_v9 = vld [vmem:[#allocation2] sm:$0x1]  ;;  %p143_p0 = scmp.lt.s32.totalorder %s585_s10, 1  ;;  %vm234_vm1 = vcmask 1045504  }
  0x1e   : > { %451 = vmatprep.mubr.msk.f32.mxu0 %vm225_vm0, %v150_v5  ;;  %454 = vmatprep.mubr.msk.f32.mxu1 %vm225_vm0, %v152_v3 }
  0x1f   : > { %s650_s10 = smov (!%p143_p0, %s585_s10), 1 }
  0x20   : > { %s145_s21 = scalar_lea.vmem %s646_s1, %s650_s10  ;;  %s148_s24 = scalar_lea.vmem %s647_s2, %s650_s10 }
  0x21   : > { %493 = vset.pattern.permute.xlu1 %v560_v1  ;;  %167 = vperm.xlu0 %491, %v152_v3   ;;  %v427_v10 = vld [vmem:[%s145_s21] ss:$0 sm:$0xff] }
  0x22   : > { %162 = vperm.xlu1 %493, %v611_v4  }
  0x25   : > { %494 = vset.pattern.permute.xlu0 %v559_v0 }
  0x26   : > { %194 = vperm.xlu0 %494, %v152_v3   ;;  %157 = vperm.xlu1 %493, %v150_v5  }
  0x2a   : > { %186 = vperm.xlu0 %494, %v150_v5   ;;  %495 = vset.pattern.permute.xlu1 %v559_v0 }
  0x2b   : > { %190 = vperm.xlu1 %495, %v611_v4  }
  0x2e   : > { %497 = vset.pattern.permute.xlu0 %v561_v6 }
  0x2f   : > { %496 = vset.pattern.permute.xlu1 %v561_v6  ;;  %214 = vperm.xlu0 %497, %v611_v4  }
  0x30   : > { %210 = vperm.xlu1 %496, %v150_v5  }
  0x33   : > { %498 = vset.pattern.permute.xlu0 %v562_v7 }
  0x34   : > { %218 = vperm.xlu1 %496, %v152_v3   ;;  %328 = vperm.xlu0 %498, %v150_v5  }
  0x38   : > { %222 = vperm.xlu1 %496, %v607_v2   ;;  %340 = vperm.xlu0 %498, %v607_v2  }
  0x3c   : > { %499 = vset.pattern.permute.xlu1 %v562_v7  ;;  %501 = vset.pattern.permute.xlu0 %v563_v8 }
  0x3d   : > { %332 = vperm.xlu1 %499, %v611_v4  }
  0x41   : > { %336 = vperm.xlu1 %499, %v152_v3  }
  0x45   : > { %500 = vset.pattern.permute.xlu1 %v563_v8 }
  0x46   : > { %359 = vperm.xlu1 %500, %v154_v9  }
  0x98   : > { %v199_v11 = vpop.permute.xlu1 %198  ;;  %v173_v12 = vpop.permute.xlu0 %172 }
  0x99   : > { %v184_v13 = vmul.f32 %v427_v10, %v173_v12 }
  0x9b   : > { %v204_v14 = vadd.f32 %v199_v11, %v184_v13 }
  0x9c   : > { %v168_v15 = vpop.permute.xlu0 %167 }
  0x9d   : > { %502 = vtanh.f32 %v204_v14  ;;  %v163_v16 = vpop.permute.xlu1 %162  ;;  %v183_v17 = vmul.f32 %v427_v10, %v168_v15 }
  0x9e   : > { %v182_v21 = vmul.f32 %v427_v10, %v163_v16 }
  0xa1   : > { %v195_v18 = vpop.permute.xlu0 %194  ;;  %v158_v19 = vpop.permute.xlu1 %157 }
  0xa2   : > { %v203_v20 = vadd.f32 %v195_v18, %v183_v17  ;;  %v181_v22 = vmul.f32 %v427_v10, %v158_v19 }
  0xa4   : > { %504 = vtanh.f32 %v203_v20 }
  0xa5   : > { %v187_v23 = vpop.permute.xlu0 %186 }
  0xa6   : > { %v191_v24 = vpop.permute.xlu1 %190  ;;  %v201_v25 = vadd.f32 %v187_v23, %v181_v22 }
  0xa7   : > { %v202_v26 = vadd.f32 %v191_v24, %v182_v21 }
  0xa9   : > { %506 = vtanh.f32 %v202_v26 }
  0xaa   : > { %v503_v27 = vpop.eup %502  ;;  %508 = vtanh.f32 %v201_v25  ;;  %v215_v33 = vpop.permute.xlu0 %214 }
  0xab   : > { %443 = vmatprep.subr.msk.mxu0 %vm234_vm1, %v503_v27  ;;  %457 = vmatprep.subr.msk.mxu1 %vm234_vm1, %v503_v27  ;;  %v211_v31 = vpop.permute.xlu1 %210 }
  0xac   : > { %444 = vmatpush3.msk.msra.mxu0 %vm234_vm1, %v503_v27  ;;  %461 = vmatpush3.msk.msra.mxu1 %vm234_vm1, %v503_v27 }
  0xaf   : > { %v219_v32 = vpop.permute.xlu1 %218  ;;  %v329_v43 = vpop.permute.xlu0 %328 }
  0xb1   : > { %v505_v28 = vpop.eup %504 }
  0xb2   : > { %445 = vmatprep.subr.mxu0 %v505_v28  ;;  %458 = vmatprep.subr.mxu1 %v505_v28 }
  0xb3   : > { %446 = vmatpush3.msra.mxu0 %v505_v28  ;;  %462 = vmatpush3.msra.mxu1 %v505_v28  ;;  %v223_v34 = vpop.permute.xlu1 %222  ;;  %v341_v47 = vpop.permute.xlu0 %340 }
  0xb6   : > { %v507_v29 = vpop.eup %506 }
  0xb7   : > { %447 = vmatprep.subr.mxu0 %v507_v29  ;;  %459 = vmatprep.subr.mxu1 %v507_v29  ;;  %v509_v30 = vpop.eup %508 }
  0xb8   : > { %448 = vmatpush3.msra.mxu0 %v507_v29  ;;  %463 = vmatpush3.msra.mxu1 %v507_v29  ;;  %v333_v44 = vpop.permute.xlu1 %332 }
  0xb9   : > { %449 = vmatprep.subr.mxu0 %v509_v30  ;;  %460 = vmatprep.subr.mxu1 %v509_v30 }
  0xba   : > { %450 = vmatpush3.msra.mxu0 %v509_v30  ;;  %464 = vmatpush3.msra.mxu1 %v509_v30 }
  0xbb   : > { %452 = vmatmul.mubr.msk.f32.vlgmr.msra.gmra.mxu0 %vm225_vm0, %v611_v4  ;;  %455 = vmatmul.mubr.msk.f32.vlgmr.msra.gmra.mxu1 %vm225_vm0, %v607_v2 }
  0xbc   : > { %v337_v53 = vpop.permute.xlu1 %336 }
  0xc1   : > { %v360_v0 = vpop.permute.xlu1 %359 }
 0x17b   : > { %v453_v35 = vpop.f32.mrf.mxu0  ;;  %v456_v36 = vpop.f32.mrf.mxu1 }
 0x17c   : > { %v310_v37 = vadd.f32 %v453_v35, %v215_v33  ;;  %v320_v38 = vadd.f32 %v456_v36, %v223_v34 }
 0x17d   : > { %v304_v39 = vpop.f32.mrf.mxu0  ;;  %v314_v40 = vpop.f32.mrf.mxu1 }
 0x17e   : > { %510 = vtanh.f32 %v310_v37  ;;  %v305_v41 = vadd.f32 %v304_v39, %v211_v31  ;;  %v315_v42 = vadd.f32 %v314_v40, %v219_v32 }
 0x17f   : > { %512 = vtanh.f32 %v320_v38 }
 0x180   : > { %514 = vtanh.f32 %v305_v41 }
 0x181   : > { %516 = vtanh.f32 %v315_v42 }
 0x18b   : > { %v511_v45 = vpop.eup %510 }
 0x18c   : > { %v513_v46 = vpop.eup %512  ;;  %v344_v51 = vmul.f32 %v511_v45, %v333_v44 }
 0x18d   : > { %v515_v48 = vpop.eup %514  ;;  %v346_v52 = vmul.f32 %v513_v46, %v341_v47 }
 0x18e   : > { %v517_v49 = vpop.eup %516  ;;  %v343_v50 = vmul.f32 %v515_v48, %v329_v43 }
 0x18f   : > { %v345_v55 = vmul.f32 %v517_v49, %v337_v53  ;;  %v349_v57 = vsel %vm234_vm1, %v346_v52, 0.0 }
 0x190   : > { %v347_v54 = vadd.f32 %v344_v51, %v343_v50 }
 0x192   : > { %v348_v56 = vadd.f32 %v347_v54, %v345_v55 }
 0x194   : > { %v350_v58 = vadd.f32 %v349_v57, %v348_v56 }
 0x196   : > { %v351_v59 = vrot.slane %v350_v58, 4 }
 0x198   : > { %v352_v60 = vadd.f32 %v351_v59, %v350_v58 }
 0x19a   : > { %v353_v61 = vrot.slane %v352_v60, 2 }
 0x19c   : > { %v354_v62 = vadd.f32 %v353_v61, %v352_v60 }
 0x19e   : > { %v355_v63 = vrot.slane %v354_v62, 1 }
 0x1a0   : > { %v356_v1 = vadd.f32 %v355_v63, %v354_v62 }
 0x1a2   : > { %v362_v2 = vadd.f32 %v360_v0, %v356_v1 }
 0x1a4   : > { %363 = vst [vmem:[%s148_s24] sm:$0x1] %v362_v2 }
 0x1a5 PF: > { %s13_s9 = sadd.s32 1, %s554_s9  }
 0x1a6   : > { %p10_p1 = scmp.ge.s32.totalorder %s13_s9, 4  }
 0x1a8   :  { %12 = sbr.rel (!%p10_p1) target bundleno = 1 (0x1), region = 63 }
 0x1ad   :  { %381 = vsyncpa [#allocation3], 1 }
 0x1ae   :  { %383 = vsyncpa [#allocation3 + $0x1], 1 }

</bundles_post_ra>
